<compile_context>
chip_gen: v7x
topology: tpu7x:2x2x1
jax: 0.10.0
libtpu: 0.0.40
codegen_flags: <defaults>
</compile_context>

<pallas_src>
import functools

import jax
import jax.numpy as jnp
from jax.experimental import pallas as pl
from jax.experimental.pallas import tpu as pltpu

LANE = 128     # vreg lane width
SUBLANE = 8    # vreg sublane width (batch tiles must be multiples of this)


def _round_up(v, m):
    return (v + m - 1) // m * m


def _cdiv(a, b):
    return (a + b - 1) // b


def _pad2d(a, rows, cols):
    r, c = a.shape
    return jnp.pad(a, ((0, rows - r), (0, cols - c)))


def _tpu_hw():
    """Trace-time HW query: (per-core VMEM bytes, 2 TCs per chip?, 256-wide MXU?)."""
    try:
        vmem = int(pltpu.get_tpu_info().vmem_capacity_bytes)
    except Exception:
        vmem = 128 * 2**20
    try:
        kind = jax.devices()[0].device_kind.lower()
    except Exception:
        kind = ""
    two_cores = (vmem <= 64 * 2**20) or ("v7" in kind) or ("7x" in kind)
    mxu_256 = any(t in kind for t in ("v6", "6e", "v7", "7x"))
    return vmem, two_cores, mxu_256


def _pad_feature(d, mxu_256):
    # Lane-dense padding only pays off once the real dim is >= one lane width;
    # tiny dims keep their true width (full-array block dim, masked store).
    if d < LANE:
        return d
    if mxu_256 and d >= 256:
        return _round_up(d, 256)      # fill the 256x256 MXU on v6e/v7x
    return _round_up(d, LANE)


def mlp_kernel(x_ref, w1_ref, b1_ref, w2_ref, b2_ref, w3_ref, b3_ref, o_ref):
    # Three bf16 MXU matmuls with f32 accumulation; bias add / ReLU in f32 on
    # the VPU, rounded once to bf16 before feeding the next matmul.
    h1 = jnp.dot(x_ref[...], w1_ref[...], preferred_element_type=jnp.float32)
    h1 = jnp.maximum(h1 + b1_ref[...], 0.0).astype(jnp.bfloat16)
    h2 = jnp.dot(h1, w2_ref[...], preferred_element_type=jnp.float32)
    h2 = jnp.maximum(h2 + b2_ref[...], 0.0).astype(jnp.bfloat16)
    y = jnp.dot(h2, w3_ref[...], preferred_element_type=jnp.float32)
    o_ref[...] = (y + b3_ref[...]).astype(o_ref.dtype)


def prepare_mlp_params(w1, b1, w2, b2, w3, b3):
    """Pad feature dims and cast weights to bf16 ONCE, outside the forward path.

    wN: (in, out) f32 (transposed vs nn.Linear.weight); bN: (1, out) f32.
    """
    _, _, mxu_256 = _tpu_hw()
    k, h1 = w1.shape
    h2, out = w2.shape[1], w3.shape[1]
    k_p, h1_p, h2_p, out_p = (_pad_feature(d, mxu_256) for d in (k, h1, h2, out))
    w1p = _pad2d(w1, k_p, h1_p).astype(jnp.bfloat16)
    w2p = _pad2d(w2, h1_p, h2_p).astype(jnp.bfloat16)
    w3p = _pad2d(w3, h2_p, out_p).astype(jnp.bfloat16)
    b1p = _pad2d(b1, 1, h1_p)     # biases stay f32 (f32 VPU add)
    b2p = _pad2d(b2, 1, h2_p)
    b3p = _pad2d(b3, 1, out_p)
    return w1p, b1p, w2p, b2p, w3p, b3p


@functools.partial(jax.jit, static_argnames=("out_features",))
def mlp_forward(x, w1p, b1p, w2p, b2p, w3p, b3p, *, out_features):
    batch, k = x.shape
    k_p, h1_p = w1p.shape
    h2_p, out_p = w3p.shape

    vmem_cap, two_cores, _ = _tpu_hw()

    # --- VMEM footprint model (bytes) --------------------------------------
    resident_bytes = ((w1p.size + w2p.size + w3p.size) * 2          # bf16, Buffered(1)
                      + (b1p.size + b2p.size + b3p.size) * 4)        # f32, Buffered(1)
    per_row_bytes = (2 * k_p * 2           # x tile, double-buffered bf16
                     + 2 * out_p * 4       # out tile, double-buffered f32
                     + (h1_p + h2_p) * 6   # hidden: f32 accumulator + bf16 value
                     + out_p * 4)          # fc3 f32 accumulator
    # Generation-aware batch tile: big tiles on 128 MiB chips, smaller on v7x.
    max_tile = 1024 if vmem_cap >= 96 * 2**20 else 512
    avail = int(0.75 * vmem_cap) - resident_bytes
    if avail > 0:
        max_tile = min(max_tile,
                       max(SUBLANE, (avail // per_row_bytes) // SUBLANE * SUBLANE))

    # Balanced tiles (avoid a nearly-empty last tile).
    num_m = max(1, _cdiv(batch, max_tile))
    if two_cores and num_m == 1 and batch > SUBLANE:
        num_m = 2     # v7x: >=2 grid steps so "parallel" shards across both TCs
    tile_m = _round_up(_cdiv(batch, num_m), SUBLANE)
    m_p = num_m * tile_m

    x_p = _pad2d(x, m_p, k_p).astype(jnp.bfloat16)

    # Resident blocks: constant index_map + single buffer (no prefetch buffer).
    resident = lambda shape: pl.BlockSpec(shape, lambda i: (0, 0),
                                          pipeline_mode=pl.Buffered(1))

    flops = 2 * m_p * (k_p * h1_p + h1_p * h2_p + h2_p * out_p)
    bytes_accessed = (x_p.size * 2 + m_p * out_p * 4
                      + (w1p.size + w2p.size + w3p.size) * 2
                      + (b1p.size + b2p.size + b3p.size) * 4)

    vmem_need = resident_bytes + tile_m * per_row_bytes
    # ~112 MiB usable on v5e/v6e, ~56 MiB on v7x; keep 2x headroom over need.
    vmem_limit = int(min(int(0.875 * vmem_cap),
                         max(2 * vmem_need, 32 * 2**20)))

    y_p = pl.pallas_call(
        mlp_kernel,
        out_shape=jax.ShapeDtypeStruct((m_p, out_p), jnp.float32),
        grid_spec=pltpu.PrefetchScalarGridSpec(
            num_scalar_prefetch=0,
            grid=(num_m,),
            in_specs=[
                pl.BlockSpec((tile_m, k_p), lambda i: (i, 0)),   # x: streamed
                resident((k_p, h1_p)), resident((1, h1_p)),      # fc1
                resident((h1_p, h2_p)), resident((1, h2_p)),     # fc2
                resident((h2_p, out_p)), resident((1, out_p)),   # fc3
            ],
            out_specs=pl.BlockSpec((tile_m, out_p), lambda i: (i, 0)),
        ),
        compiler_params=pltpu.CompilerParams(
            dimension_semantics=("parallel",),    # megacore sharding on v7x
            vmem_limit_bytes=vmem_limit,
        ),
        cost_estimate=pl.CostEstimate(
            flops=flops, transcendentals=0, bytes_accessed=bytes_accessed),
    )(x_p, w1p, b1p, w2p, b2p, w3p, b3p)

    return y_p[:batch, :out_features]


def init_linear_params(key, in_features, out_features):
    # Deterministic init mimicking nn.Linear's uniform(-1/sqrt(in), 1/sqrt(in)).
    kw, kb = jax.random.split(key)
    bound = 1.0 / jnp.sqrt(jnp.float32(in_features))
    # Stored as [in, out] so the kernel computes x @ W directly.
    w = jax.random.uniform(kw, (in_features, out_features), jnp.float32, -bound, bound)
    b = jax.random.uniform(kb, (1, out_features), jnp.float32, -bound, bound)
    return w, b


if __name__ == "__main__":
    input_size, hidden1, hidden2, output_size = 8, 64, 32, 4
    batch = 16

    key = jax.random.PRNGKey(0)
    kx, k1, k2, k3 = jax.random.split(key, 4)

    x = jax.random.normal(kx, (batch, input_size), jnp.float32)
    w1, b1 = init_linear_params(k1, input_size, hidden1)
    w2, b2 = init_linear_params(k2, hidden1, hidden2)
    w3, b3 = init_linear_params(k3, hidden2, output_size)

    # One-time param prep (pad + bf16 cast) hoisted out of the forward path.
    params = prepare_mlp_params(w1, b1, w2, b2, w3, b3)

    y = mlp_forward(x, *params, out_features=output_size)
    jax.block_until_ready(y)

    # Pure-JAX reference with matching bf16 rounding of matmul operands
    # (f32 accumulation; eval-mode dropout == identity).
    bf = lambda a: a.astype(jnp.bfloat16).astype(jnp.float32)
    r1 = jnp.maximum(bf(x) @ bf(w1) + b1, 0.0)
    r2 = jnp.maximum(bf(r1) @ bf(w2) + b2, 0.0)
    y_ref = bf(r2) @ bf(w3) + b3

    assert y.shape == (batch, output_size)
    assert jnp.allclose(y, y_ref, atol=5e-2, rtol=5e-2), float(jnp.max(jnp.abs(y - y_ref)))
    print("KERNEL_OK")
</pallas_src>

<mosaic_0001>
module attributes {stable_mosaic.version = 11 : i64} {
  func.func @mlp_kernel(%arg0: i32, %arg1: memref<16x8xbf16, #tpu.memory_space<vmem>>, %arg2: memref<8x64xbf16, #tpu.memory_space<vmem>>, %arg3: memref<1x64xf32, #tpu.memory_space<vmem>>, %arg4: memref<64x32xbf16, #tpu.memory_space<vmem>>, %arg5: memref<1x32xf32, #tpu.memory_space<vmem>>, %arg6: memref<32x4xbf16, #tpu.memory_space<vmem>>, %arg7: memref<1x4xf32, #tpu.memory_space<vmem>>, %arg8: memref<16x4xf32, #tpu.memory_space<vmem>>) attributes {dimension_semantics = [#tpu.dimension_semantics<parallel>], iteration_bounds = array<i64: 1>, scalar_prefetch = 0 : i64, scratch_operands = 0 : i64, tpu.core_type = #tpu.core_type<tc>, window_params = [{transform_indices = @transform_0, window_bounds = array<i64: 16, 8>}, {pipeline_mode = #tpu.pipeline_mode<synchronous>, transform_indices = @transform_1, window_bounds = array<i64: 8, 64>}, {pipeline_mode = #tpu.pipeline_mode<synchronous>, transform_indices = @transform_2, window_bounds = array<i64: 1, 64>}, {pipeline_mode = #tpu.pipeline_mode<synchronous>, transform_indices = @transform_3, window_bounds = array<i64: 64, 32>}, {pipeline_mode = #tpu.pipeline_mode<synchronous>, transform_indices = @transform_4, window_bounds = array<i64: 1, 32>}, {pipeline_mode = #tpu.pipeline_mode<synchronous>, transform_indices = @transform_5, window_bounds = array<i64: 32, 4>}, {pipeline_mode = #tpu.pipeline_mode<synchronous>, transform_indices = @transform_6, window_bounds = array<i64: 1, 4>}, {transform_indices = @transform_7, window_bounds = array<i64: 16, 4>}]} {
    %c0 = arith.constant 0 : index
    %c0_0 = arith.constant 0 : index
    %0 = vector.load %arg1[%c0, %c0_0] : memref<16x8xbf16, #tpu.memory_space<vmem>>, vector<16x8xbf16>
    %c0_1 = arith.constant 0 : index
    %c0_2 = arith.constant 0 : index
    %1 = vector.load %arg2[%c0_1, %c0_2] : memref<8x64xbf16, #tpu.memory_space<vmem>>, vector<8x64xbf16>
    %cst = arith.constant dense<0.000000e+00> : vector<16x64xf32>
    %2 = tpu.matmul %0, %1, %cst {dimension_numbers = #tpu.dot_dimension_numbers<[1], [0], [0], [1], [0, 0, 1, 1], [], []>} : vector<16x8xbf16>, vector<8x64xbf16>, vector<16x64xf32> -> vector<16x64xf32>
    %c0_3 = arith.constant 0 : index
    %c0_4 = arith.constant 0 : index
    %3 = vector.load %arg3[%c0_3, %c0_4] : memref<1x64xf32, #tpu.memory_space<vmem>>, vector<1x64xf32>
    %4 = vector.broadcast %3 : vector<1x64xf32> to vector<16x64xf32>
    %5 = arith.addf %2, %4 : vector<16x64xf32>
    %cst_5 = arith.constant 0.000000e+00 : f32
    %6 = vector.broadcast %cst_5 : f32 to vector<16x64xf32>
    %7 = arith.maximumf %5, %6 : vector<16x64xf32>
    %8 = arith.truncf %7 : vector<16x64xf32> to vector<16x64xbf16>
    %c0_6 = arith.constant 0 : index
    %c0_7 = arith.constant 0 : index
    %9 = vector.load %arg4[%c0_6, %c0_7] : memref<64x32xbf16, #tpu.memory_space<vmem>>, vector<64x32xbf16>
    %cst_8 = arith.constant dense<0.000000e+00> : vector<16x32xf32>
    %10 = tpu.matmul %8, %9, %cst_8 {dimension_numbers = #tpu.dot_dimension_numbers<[1], [0], [0], [1], [0, 0, 1, 1], [], []>} : vector<16x64xbf16>, vector<64x32xbf16>, vector<16x32xf32> -> vector<16x32xf32>
    %c0_9 = arith.constant 0 : index
    %c0_10 = arith.constant 0 : index
    %11 = vector.load %arg5[%c0_9, %c0_10] : memref<1x32xf32, #tpu.memory_space<vmem>>, vector<1x32xf32>
    %12 = vector.broadcast %11 : vector<1x32xf32> to vector<16x32xf32>
    %13 = arith.addf %10, %12 : vector<16x32xf32>
    %cst_11 = arith.constant 0.000000e+00 : f32
    %14 = vector.broadcast %cst_11 : f32 to vector<16x32xf32>
    %15 = arith.maximumf %13, %14 : vector<16x32xf32>
    %16 = arith.truncf %15 : vector<16x32xf32> to vector<16x32xbf16>
    %c0_12 = arith.constant 0 : index
    %c0_13 = arith.constant 0 : index
    %17 = vector.load %arg6[%c0_12, %c0_13] : memref<32x4xbf16, #tpu.memory_space<vmem>>, vector<32x4xbf16>
    %cst_14 = arith.constant dense<0.000000e+00> : vector<16x4xf32>
    %18 = tpu.matmul %16, %17, %cst_14 {dimension_numbers = #tpu.dot_dimension_numbers<[1], [0], [0], [1], [0, 0, 1, 1], [], []>} : vector<16x32xbf16>, vector<32x4xbf16>, vector<16x4xf32> -> vector<16x4xf32>
    %c0_15 = arith.constant 0 : index
    %c0_16 = arith.constant 0 : index
    %19 = vector.load %arg7[%c0_15, %c0_16] : memref<1x4xf32, #tpu.memory_space<vmem>>, vector<1x4xf32>
    %20 = vector.broadcast %19 : vector<1x4xf32> to vector<16x4xf32>
    %21 = arith.addf %18, %20 : vector<16x4xf32>
    %c0_17 = arith.constant 0 : index
    %c0_18 = arith.constant 0 : index
    %22 = vector.load %arg8[%c0_17, %c0_18] : memref<16x4xf32, #tpu.memory_space<vmem>>, vector<16x4xf32>
    tpu.vector_store %arg8[%c0_17, %c0_18], %21 {strides = array<i32>} : memref<16x4xf32, #tpu.memory_space<vmem>>, vector<16x4xf32>,
    return
  }
  func.func @transform_0(%arg0: i32) -> (i32, i32) {
    %c0_i32 = arith.constant 0 : i32
    %c0_i32_0 = arith.constant 0 : i32
    return %arg0, %c0_i32 : i32, i32
  }
  func.func @transform_1(%arg0: i32) -> (i32, i32) {
    %c0_i32 = arith.constant 0 : i32
    %c0_i32_0 = arith.constant 0 : i32
    %c0_i32_1 = arith.constant 0 : i32
    return %c0_i32, %c0_i32_0 : i32, i32
  }
  func.func @transform_2(%arg0: i32) -> (i32, i32) {
    %c0_i32 = arith.constant 0 : i32
    %c0_i32_0 = arith.constant 0 : i32
    %c0_i32_1 = arith.constant 0 : i32
    return %c0_i32, %c0_i32_0 : i32, i32
  }
  func.func @transform_3(%arg0: i32) -> (i32, i32) {
    %c0_i32 = arith.constant 0 : i32
    %c0_i32_0 = arith.constant 0 : i32
    %c0_i32_1 = arith.constant 0 : i32
    return %c0_i32, %c0_i32_0 : i32, i32
  }
  func.func @transform_4(%arg0: i32) -> (i32, i32) {
    %c0_i32 = arith.constant 0 : i32
    %c0_i32_0 = arith.constant 0 : i32
    %c0_i32_1 = arith.constant 0 : i32
    return %c0_i32, %c0_i32_0 : i32, i32
  }
  func.func @transform_5(%arg0: i32) -> (i32, i32) {
    %c0_i32 = arith.constant 0 : i32
    %c0_i32_0 = arith.constant 0 : i32
    %c0_i32_1 = arith.constant 0 : i32
    return %c0_i32, %c0_i32_0 : i32, i32
  }
  func.func @transform_6(%arg0: i32) -> (i32, i32) {
    %c0_i32 = arith.constant 0 : i32
    %c0_i32_0 = arith.constant 0 : i32
    %c0_i32_1 = arith.constant 0 : i32
    return %c0_i32, %c0_i32_0 : i32, i32
  }
  func.func @transform_7(%arg0: i32) -> (i32, i32) {
    %c0_i32 = arith.constant 0 : i32
    %c0_i32_0 = arith.constant 0 : i32
    return %arg0, %c0_i32 : i32, i32
  }
}

</mosaic_0001>

<bundles_post_ra>
// kernel: mlp_forward.1
= control target key start
LH: loop header
LB: loop body
LE: loop exit
PB: predicated region body
PF: predicated region fallthrough
CT: control target
= control target key end

     0   :  { %vm46_vm0 = vcmask 1043456   ;;  %v314_v0 = vmov 0.0   ;;  %vm315_vm1 = vmmov 0   ;;  %vm42_vm2 = vcmask 64512   ;;  %s395_s1 = inlined_call_operand.vmem [shape: bf16[8,64], index: 1, kind: input, shape index: {}]   ;;  %s396_s0 = inlined_call_operand.vmem [shape: bf16[16,8], index: 0, kind: input, shape index: {}]   ;;  %s397_s3 = inlined_call_operand.vmem [shape: bf16[64,32], index: 3, kind: input, shape index: {}]   ;;  %s398_s2 = inlined_call_operand.vmem [shape: f32[1,64], index: 2, kind: input, shape index: {}]   ;;  %s399_s5 = inlined_call_operand.vmem [shape: bf16[32,4], index: 5, kind: input, shape index: {}]   ;;  %s400_s4 = inlined_call_operand.vmem [shape: f32[1,32], index: 4, kind: input, shape index: {}]   ;;  %s401_s6 = inlined_call_operand.vmem [shape: f32[1,4], index: 6, kind: input, shape index: {}]   ;;  %s402_s7 = inlined_call_operand.vmem [shape: f32[16,4], index: 7, kind: output, shape index: {}]  }
   0x1   :  { %279 = vmatprep.subr.bf16.mxu0 %v314_v0  ;;  %v29_v1 = vld [vmem:[%s395_s1] sm:$0xf]  ;;  %281 = vmatprep.mubr.msk.bf16.mxu0 %vm315_vm1, %v314_v0  ;;  %v309_v5 = vld [vmem:[%s397_s3 + $0x8] sm:$0xff]   ;;  %v310_v6 = vld [vmem:[%s397_s3 + $0x10] sm:$0xff]   ;;  %vm133_vm3 = vcmask 523264   ;;  %vm204_vm4 = vcmask 261120  }
   0x2   :  { %v48_v2 = vsel %vm46_vm0, %v29_v1, 0  ;;  %v307_v3 = vld [vmem:[%s396_s0] sm:$0xff]   ;;  %285 = vmatprep.subr.bf16.mxu1 %v314_v0  ;;  %293 = vmatprep.mubr.msk.bf16.mxu1 %vm315_vm1, %v314_v0  ;;  %v311_v7 = vld [vmem:[%s397_s3 + $0x18] sm:$0xff]   ;;  %v313_v19 = vld [vmem:[%s399_s5 + $0x8] sm:$0xff]   ;;  %vm249_vm5 = vcmask 31744  }
   0x3   :  { %280 = vmatpush3.bf16.msra.mxu0 %v48_v2  ;;  %v308_v4 = vld [vmem:[%s397_s3] sm:$0xff]  }
   0x4   :  { %297 = vmatprep.subr.bf16.mxu0 %v314_v0  ;;  %286 = vmatpush3.bf16.msra.mxu1 %v308_v4  ;;  %v256_v8 = vld [vmem:[%s398_s2] ss:$0 sm:$0xff] }
   0x5   :  { %287 = vmatprep.subr.bf16.mxu1 %v314_v0  ;;  %v312_v18 = vld [vmem:[%s399_s5] sm:$0xff]  }
   0x6   :  { %282 = vmatmul.mubr.msk.bf16.vlgmr.msra.gmra.mrb[0].mxu0 %vm42_vm2, %v307_v3  ;;  %v259_v20 = vld [vmem:[%s400_s4] ss:$0 sm:$0xff] }
   0x7   :  { %301 = vmatprep.mubr.msk.bf16.mxu0 %vm315_vm1, %v314_v0  ;;  %298 = vmatpush3.bf16.msra.mxu0 %v312_v18  ;;  %v265_v30 = vld [vmem:[%s401_s6] ss:$0 sm:$0xff] }
   0x8   :  { %288 = vmatpush3.bf16.msra.mxu1 %v309_v5  ;;  %299 = vmatprep.subr.bf16.mxu0 %v314_v0 }
   0x9   :  { %289 = vmatprep.subr.bf16.mxu1 %v314_v0 }
   0xb   :  { %300 = vmatpush3.bf16.msra.mxu0 %v313_v19 }
   0xc   :  { %290 = vmatpush3.bf16.msra.mxu1 %v310_v6 }
   0xd   :  { %291 = vmatprep.subr.bf16.mxu1 %v314_v0 }
  0x10   :  { %292 = vmatpush3.bf16.msra.mxu1 %v311_v7 }
  0xd9   :  { %v84_v9 = vpop.f32.mrb[0].mxu0 }
  0xda   :  { %v85_v10 = vadd.f32 %v256_v8, %v84_v9  ;;  %v283_v11 = vpop.f32.mrb[1].mxu0 }
  0xdb   :  { %v87_v12 = vpop.f32.mrb[2].mxu0 }
  0xdc   :  { %v88_v13 = vadd.f32 %v256_v8, %v87_v12  ;;  %v284_v14 = vpop.f32.mrb[3].mxu0  ;;  %v91_v15 = vmax.f32 %v85_v10, 0.0 }
  0xde   :  { %v92_v16 = vmax.f32 %v88_v13, 0.0 }
  0xe0   :  { %v93_v17 = vpack.c.bf16 %v92_v16, %v91_v15 }
  0xe2   :  { %294 = vmatmul.mubr.msk.bf16.vlgmr.msra.gmra.mrb[0].mxu1 %vm133_vm3, %v93_v17 }
 0x1b5   :  { %v171_v21 = vpop.f32.mrb[0].mxu1 }
 0x1b6   :  { %v172_v22 = vadd.f32 %v259_v20, %v171_v21  ;;  %v295_v23 = vpop.f32.mrb[1].mxu1 }
 0x1b7   :  { %v174_v24 = vpop.f32.mrb[2].mxu1 }
 0x1b8   :  { %v175_v25 = vadd.f32 %v259_v20, %v174_v24  ;;  %v296_v26 = vpop.f32.mrb[3].mxu1  ;;  %v178_v27 = vmax.f32 %v172_v22, 0.0 }
 0x1ba   :  { %v179_v28 = vmax.f32 %v175_v25, 0.0 }
 0x1bc   :  { %v180_v29 = vpack.c.bf16 %v179_v28, %v178_v27 }
 0x1be   :  { %302 = vmatmul.mubr.msk.bf16.vlgmr.msra.gmra.mrb[4].mxu0 %vm204_vm4, %v180_v29 }
 0x291   :  { %v242_v31 = vpop.f32.mrb[4].mxu0 }
 0x292   :  { %v243_v32 = vadd.f32 %v265_v30, %v242_v31  ;;  %v303_v33 = vpop.f32.mrb[5].mxu0 }
 0x293   :  { %v245_v34 = vpop.f32.mrb[6].mxu0 }
 0x294   :  { %250 = vst.msk [vmem:[%s402_s7] sm:$0xff] %vm249_vm5, %v243_v32  ;;  %v246_v35 = vadd.f32 %v265_v30, %v245_v34  ;;  %v304_v36 = vpop.f32.mrb[7].mxu0 }
 0x296   :  { %251 = vst.msk [vmem:[%s402_s7 + $0x8] sm:$0xff] %vm249_vm5, %v246_v35 }

</bundles_post_ra>
